<compile_context>
chip_gen: v7x
topology: tpu7x:2x2x1
jax: 0.10.0
libtpu: 0.0.40
codegen_flags: <defaults>
</compile_context>

<pallas_src>
import jax
import jax.numpy as jnp
from jax import lax
from jax.experimental import pallas as pl
from jax.experimental.pallas import tpu as pltpu

BN_EPS = 1e-5


def prior_kernel(c_ref, w1_ref, w2_ref, p_ref, out_ref):
    """
    c_ref   : VMEM (B, 1)     int32  class indices
    w1_ref  : VMEM (C, L)     f32    fc1 weight, stored transposed ([in, out])
    w2_ref  : VMEM (L, Npad)  f32    [fc21.W^T | fc22.W^T | 0-pad]  (fused heads)
    p_ref   : VMEM (3, Npad)  f32    row 0: gamma | 0-pad
                                     row 1: beta  | 0-pad
                                     row 2: [fc21.b | fc22.b | 0-pad]
    out_ref : VMEM (B, Npad)  f32    [mu | log_var | 0-pad]  lane-dense slab
    """
    B = out_ref.shape[0]
    C, L = w1_ref.shape

    # ---- fc1 (Linear, no bias) on one-hot input: vectorized one-hot + MXU ----
    # Out-of-range indices yield an all-zero row (same as jax.nn.one_hot).
    cls = c_ref[...]                                            # [B, 1] int32
    onehot = (lax.broadcasted_iota(jnp.int32, (B, C), 1) == cls
              ).astype(jnp.float32)                             # [B, C]
    h = jnp.dot(onehot, w1_ref[...],
                preferred_element_type=jnp.float32)             # [B, L]

    # ---- BatchNorm1d (training mode: batch mean, biased batch variance) ----
    mean = jnp.mean(h, axis=0, keepdims=True)                   # [1, L]
    mean_sq = jnp.mean(h * h, axis=0, keepdims=True)            # [1, L]
    var = mean_sq - mean * mean
    scale = p_ref[0:1, :L] * lax.rsqrt(var + BN_EPS)            # gamma folded in
    hn = (h - mean) * scale + p_ref[1:2, :L]

    # ---- ReLU ----
    hr = jnp.maximum(hn, 0.0)

    # ---- fused fc21 | fc22 heads: one MXU matmul, one lane-dense store ----
    out_ref[...] = (jnp.dot(hr, w2_ref[...], preferred_element_type=jnp.float32)
                    + p_ref[2:3, :])


def prior_forward(c, params):
    """c: int [B]; returns (mu, log_var), each [B, latent_dim] float32."""
    w1, w2, pslab = params
    B = c.shape[0]
    C, L = w1.shape
    npad = w2.shape[1]                       # lane-dense output width (>=128)

    vmem = pl.BlockSpec(memory_space=pltpu.MemorySpace.VMEM)

    out = pl.pallas_call(
        prior_kernel,
        out_shape=jax.ShapeDtypeStruct((B, npad), jnp.float32),
        in_specs=[vmem, vmem, vmem, vmem],
        out_specs=vmem,
        compiler_params=pltpu.CompilerParams(vmem_limit_bytes=8 * 1024 * 1024),
        cost_estimate=pl.CostEstimate(
            flops=2 * B * C * L + 2 * B * L * npad + 8 * B * L,
            transcendentals=L,
            bytes_accessed=4 * (B + C * L + L * npad + 3 * npad + B * npad)),
    )(c.astype(jnp.int32).reshape(B, 1), w1, w2, pslab)

    mu = out[:, :L]
    log_var = out[:, L:2 * L]
    return mu, log_var


def xavier_uniform(key, fan_in, fan_out):
    # Matches torch.nn.init.xavier_uniform_ for a Linear weight [out, in];
    # directly produces the transposed [in, out] layout used by the kernel.
    bound = (6.0 / (fan_in + fan_out)) ** 0.5
    return jax.random.uniform(key, (fan_in, fan_out), jnp.float32, -bound, bound)


def init_params(key, classes, latent_dim):
    """Returns call-ready params: fused/padded once here, not per forward."""
    k1, k2, k3 = jax.random.split(key, 3)
    L = latent_dim
    N = 2 * L
    npad = max(128, ((N + 127) // 128) * 128)

    w1 = xavier_uniform(k1, classes, L)                 # fc1 Linear (no bias), [C, L]
    gamma = jnp.ones((L,), jnp.float32)                 # BatchNorm weight = 1
    beta = jnp.zeros((L,), jnp.float32)                 # BatchNorm bias  = 0
    w21 = xavier_uniform(k2, L, L)                      # fc21 Linear weight^T
    b21 = jnp.zeros((L,), jnp.float32)
    w22 = xavier_uniform(k3, L, L)                      # fc22 Linear weight^T
    b22 = jnp.zeros((L,), jnp.float32)

    # Fused heads: [fc21.W^T | fc22.W^T | 0-pad]  -> [L, npad]
    w2 = jnp.zeros((L, npad), jnp.float32).at[:, :N].set(
        jnp.concatenate([w21, w22], axis=1))
    # Packed per-feature param slab: gamma / beta / fused bias  -> [3, npad]
    pslab = jnp.zeros((3, npad), jnp.float32)
    pslab = pslab.at[0, :L].set(gamma)
    pslab = pslab.at[1, :L].set(beta)
    pslab = pslab.at[2, :N].set(jnp.concatenate([b21, b22]))
    return (w1, w2, pslab)


def prior_reference(c, params):
    """Pure-JAX reference (same training-mode BN semantics)."""
    w1, w2, pslab = params
    C, L = w1.shape
    gamma = pslab[0, :L]
    beta = pslab[1, :L]
    w21, w22 = w2[:, :L], w2[:, L:2 * L]
    b21, b22 = pslab[2, :L], pslab[2, L:2 * L]

    x = jax.nn.one_hot(c, C, dtype=jnp.float32)
    h = x @ w1
    mean = jnp.mean(h, axis=0, keepdims=True)
    var = jnp.mean((h - mean) ** 2, axis=0, keepdims=True)
    hr = jnp.maximum((h - mean) * lax.rsqrt(var + BN_EPS) * gamma + beta, 0.0)
    return hr @ w21 + b21, hr @ w22 + b22


if __name__ == "__main__":
    classes, latent_dim, batch = 16, 32, 8

    key = jax.random.PRNGKey(0)
    k_param, k_data = jax.random.split(key)
    params = init_params(k_param, classes, latent_dim)
    c = jax.random.randint(k_data, (batch,), 0, classes, dtype=jnp.int32)

    mu, log_var = jax.jit(prior_forward)(c, params)
    jax.block_until_ready((mu, log_var))

    mu_ref, lv_ref = prior_reference(c, params)
    assert mu.shape == (batch, latent_dim) and log_var.shape == (batch, latent_dim)
    assert mu.dtype == jnp.float32 and log_var.dtype == jnp.float32
    assert jnp.allclose(mu, mu_ref, rtol=1e-5, atol=1e-4)
    assert jnp.allclose(log_var, lv_ref, rtol=1e-5, atol=1e-4)
    print("KERNEL_OK")
</pallas_src>

<mosaic_0001>
module attributes {stable_mosaic.version = 11 : i64} {
  func.func @prior_kernel(%arg0: memref<8x1xi32, #tpu.memory_space<vmem>>, %arg1: memref<16x32xf32, #tpu.memory_space<vmem>>, %arg2: memref<32x128xf32, #tpu.memory_space<vmem>>, %arg3: memref<3x128xf32, #tpu.memory_space<vmem>>, %arg4: memref<8x128xf32, #tpu.memory_space<vmem>>) attributes {dimension_semantics = [], scalar_prefetch = 0 : i64, scratch_operands = 0 : i64, tpu.core_type = #tpu.core_type<tc>} {
    %c0 = arith.constant 0 : index
    %c0_0 = arith.constant 0 : index
    %0 = vector.load %arg0[%c0, %c0_0] : memref<8x1xi32, #tpu.memory_space<vmem>>, vector<8x1xi32>
    %1 = tpu.iota {dimensions = array<i32: 1>} : vector<8x16xi32>
    %2 = vector.broadcast %0 : vector<8x1xi32> to vector<8x16xi32>
    %3 = arith.cmpi eq, %1, %2 : vector<8x16xi32>
    %4 = arith.extui %3 : vector<8x16xi1> to vector<8x16xi32>
    %5 = arith.sitofp %4 : vector<8x16xi32> to vector<8x16xf32>
    %c0_1 = arith.constant 0 : index
    %c0_2 = arith.constant 0 : index
    %6 = vector.load %arg1[%c0_1, %c0_2] : memref<16x32xf32, #tpu.memory_space<vmem>>, vector<16x32xf32>
    %cst = arith.constant dense<0.000000e+00> : vector<8x32xf32>
    %7 = tpu.matmul %5, %6, %cst {dimension_numbers = #tpu.dot_dimension_numbers<[1], [0], [0], [1], [0, 0, 1, 1], [], []>} : vector<8x16xf32>, vector<16x32xf32>, vector<8x32xf32> -> vector<8x32xf32>
    %cst_3 = arith.constant dense<0.000000e+00> : vector<32xf32>
    %8 = vector.multi_reduction <add>, %7, %cst_3 [0] : vector<8x32xf32> to vector<32xf32>
    %9 = vector.shape_cast %8 : vector<32xf32> to vector<1x32xf32>
    %cst_4 = arith.constant 8.000000e+00 : f32
    %10 = vector.broadcast %cst_4 : f32 to vector<1x32xf32>
    %11 = arith.divf %9, %10 : vector<1x32xf32>
    %12 = arith.mulf %7, %7 : vector<8x32xf32>
    %cst_5 = arith.constant dense<0.000000e+00> : vector<32xf32>
    %13 = vector.multi_reduction <add>, %12, %cst_5 [0] : vector<8x32xf32> to vector<32xf32>
    %14 = vector.shape_cast %13 : vector<32xf32> to vector<1x32xf32>
    %cst_6 = arith.constant 8.000000e+00 : f32
    %15 = vector.broadcast %cst_6 : f32 to vector<1x32xf32>
    %16 = arith.divf %14, %15 : vector<1x32xf32>
    %17 = arith.mulf %11, %11 : vector<1x32xf32>
    %18 = arith.subf %16, %17 : vector<1x32xf32>
    %c0_7 = arith.constant 0 : index
    %c0_8 = arith.constant 0 : index
    %19 = vector.load %arg3[%c0_7, %c0_8] : memref<3x128xf32, #tpu.memory_space<vmem>>, vector<1x32xf32>
    %cst_9 = arith.constant 9.99999974E-6 : f32
    %20 = vector.broadcast %cst_9 : f32 to vector<1x32xf32>
    %21 = arith.addf %18, %20 : vector<1x32xf32>
    %22 = math.rsqrt %21 : vector<1x32xf32>
    %23 = arith.mulf %19, %22 : vector<1x32xf32>
    %24 = vector.broadcast %11 : vector<1x32xf32> to vector<8x32xf32>
    %25 = arith.subf %7, %24 : vector<8x32xf32>
    %26 = vector.broadcast %23 : vector<1x32xf32> to vector<8x32xf32>
    %27 = arith.mulf %25, %26 : vector<8x32xf32>
    %c1 = arith.constant 1 : index
    %c0_10 = arith.constant 0 : index
    %28 = vector.load %arg3[%c1, %c0_10] : memref<3x128xf32, #tpu.memory_space<vmem>>, vector<1x32xf32>
    %29 = vector.broadcast %28 : vector<1x32xf32> to vector<8x32xf32>
    %30 = arith.addf %27, %29 : vector<8x32xf32>
    %cst_11 = arith.constant 0.000000e+00 : f32
    %31 = vector.broadcast %cst_11 : f32 to vector<8x32xf32>
    %32 = arith.maximumf %30, %31 : vector<8x32xf32>
    %c0_12 = arith.constant 0 : index
    %c0_13 = arith.constant 0 : index
    %33 = vector.load %arg2[%c0_12, %c0_13] : memref<32x128xf32, #tpu.memory_space<vmem>>, vector<32x128xf32>
    %cst_14 = arith.constant dense<0.000000e+00> : vector<8x128xf32>
    %34 = tpu.matmul %32, %33, %cst_14 {dimension_numbers = #tpu.dot_dimension_numbers<[1], [0], [0], [1], [0, 0, 1, 1], [], []>} : vector<8x32xf32>, vector<32x128xf32>, vector<8x128xf32> -> vector<8x128xf32>
    %c2 = arith.constant 2 : index
    %c0_15 = arith.constant 0 : index
    %35 = vector.load %arg3[%c2, %c0_15] : memref<3x128xf32, #tpu.memory_space<vmem>>, vector<1x128xf32>
    %36 = vector.broadcast %35 : vector<1x128xf32> to vector<8x128xf32>
    %37 = arith.addf %34, %36 : vector<8x128xf32>
    %c0_16 = arith.constant 0 : index
    %c0_17 = arith.constant 0 : index
    %38 = vector.load %arg4[%c0_16, %c0_17] : memref<8x128xf32, #tpu.memory_space<vmem>>, vector<8x128xf32>
    tpu.vector_store %arg4[%c0_16, %c0_17], %37 {strides = array<i32>} : memref<8x128xf32, #tpu.memory_space<vmem>>, vector<8x128xf32>,
    return
  }
}

</mosaic_0001>

<bundles_post_ra>
// kernel: prior_forward.1
= control target key start
LH: loop header
LB: loop body
LE: loop exit
PB: predicated region body
PF: predicated region fallthrough
CT: control target
= control target key end

     0   :  { %9 = vsyncpa [#allocation3], 0  ;;  %s316_s15 = smov [#allocation2]   ;;  %s384_s0 = inlined_call_operand.vmem [shape: s32[8,1], index: 0, kind: input, shape index: {}]   ;;  %s385_s1 = inlined_call_operand.vmem [shape: f32[16,32], index: 1, kind: input, shape index: {}]   ;;  %s386_s2 = inlined_call_operand.hbm [shape: f32[32,128], index: 2, kind: input, shape index: {}]   ;;  %s387_s3 = inlined_call_operand.vmem [shape: f32[3,128], index: 3, kind: input, shape index: {}]   ;;  %s388_s4 = inlined_call_operand.vmem [shape: f32[8,128], index: 4, kind: output, shape index: {}]  }
   0x1   :  { %s19_s16 = sshll.u32 %s316_s15, 4  ;;  %s292_s19 = scalar_lea.hbm %s386_s2, 512  ;;  %s20_s16 = int_to_ptr.vmem [resolvable:$true] %s19_s16 }
   0x2   :  { %p293_p0 = scmp.ne.s32.totalorder %s386_s2, %s292_s19  ;;  %p296_p1 = scmp.lt.u32.totalorder %s292_s19, %s386_s2 }
   0x4   :  { %p298_p2 = pnand %p296_p1, %p293_p0 }
   0x6   :  { %301 = shalt.err (!%p298_p2)
}
   0x7   :  { %s302_s24 = scalar_lea.vmem %s20_s16, 512  ;;  %p307_p4 = scmp.lt.s32.totalorder %s20_s16, %s20_s16 }
   0x8   :  { %p303_p3 = scmp.ne.s32.totalorder %s20_s16, %s302_s24  ;;  %p308_p5 = scmp.lt.s32.totalorder %s302_s24, %s302_s24 }
   0xa   :  { %p309_p6 = por %p308_p5, %p307_p4 }
   0xc   :  { %p310_p7 = pnand %p309_p6, %p303_p3 }
   0xe   :  { %313 = shalt.err (!%p310_p7)
}
   0xf   :  { %s317_s25 = smov 128   ;;  %s318_s26 = smov 8  }
  0x10   :  { %25 = dma.hbm_to_vmem [thread:$0]  %s386_s2, 512, %s20_s16, [#allocation3], %s317_s25, %s317_s25, %s318_s26  }
  0x11   :  { %314 = dma.done.wait [#allocation3], 512  }
  0x12   :  { %315 = vsyncadd [#allocation3], 4294966784  ;;  %v319_v0 = vmov 0   ;;  %v320_v1 = vmov 0.0|0.0   ;;  %v31_v2 = vld [vmem:[%s384_s0] sm:$0xff]  ;;  %v41_v4 = vld [vmem:[%s385_s1 + $0x8] sm:$0xff]  ;;  %v32_v7 = vlaneseq }
  0x13   :  { %289 = vset.pattern.permute.xlu0 %v319_v0  ;;  %273 = vmatprep.subr.bf16.mxu0 %v320_v1  ;;  %v40_v3 = vld [vmem:[%s385_s1] sm:$0xff]  ;;  %vm321_vm0 = vmmov 0   ;;  %v322_v6 = vmov 0.0   ;;  %vm42_vm1 = vcmask 130048   ;;  %v155_v12 = vld [vmem:[#allocation2 + $0x8] sm:$0xff]  ;;  %v156_v14 = vld [vmem:[#allocation2 + $0x10] sm:$0xff] }
  0x14   :  { %276 = vmatprep.subr.bf16.mxu1 %v320_v1  ;;  %35 = vperm.xlu0 %289, %v31_v2   ;;  %v274_v5 = vpack.c.bf16 %v41_v4, %v40_v3  ;;  %v33_v8 = vand.u32 127, %v32_v7  ;;  %v154_v11 = vld [vmem:[#allocation2] sm:$0xff]  ;;  %v157_v15 = vld [vmem:[#allocation2 + $0x18] sm:$0xff]  ;;  %vm116_vm3 = vcmask 261120   ;;  %v143_v39 = vshrl.u32 %v32_v7, 7 }
  0x15   :  { %259 = vmatprep.mubr.msk.f32.mxu0 %vm321_vm0, %v322_v6  ;;  %270 = vmatprep.mubr.msk.f32.mxu1 %vm321_vm0, %v322_v6  ;;  %v277_v13 = vpack.c.bf16 %v155_v12, %v154_v11  ;;  %v280_v16 = vpack.c.bf16 %v157_v15, %v156_v14  ;;  %v137_v40 = vld [vmem:[%s387_s3] sm:$0x1]  ;;  %v244_v46 = vld [vmem:[%s387_s3 + $0x1] ss:$0 sm:$0xff]  ;;  %v245_v50 = vld [vmem:[%s387_s3 + $0x2] ss:$0 sm:$0xff] }
  0x16   :  { %275 = vmatpush3.bf16.msra.mxu0 %v274_v5  ;;  %v144_v41 = vsub.s32 0, %v143_v39 }
  0x17   :  { %278 = vmatpush3.bf16.msra.mxu1 %v277_v13 }
  0x18   :  { %279 = vmatprep.subr.bf16.mxu1 %v320_v1 }
  0x1b   :  { %281 = vmatpush3.bf16.msra.mxu1 %v280_v16 }
  0x93   :  { %v36_v9 = vpop.permute.xlu0 %35 }
  0x94   :  { %vm37_vm2 = vcmp.eq.s32.totalorder %v33_v8, %v36_v9 }
  0x95   :  { %v242_v10 = vsel %vm37_vm2, 1.0, %v322_v6 }
  0x96   :  { %260 = vmatmul.mubr.msk.f32.vlgmr.msra.gmra.mrb[0].mxu0 %vm42_vm1, %v242_v10 }
 0x169   :  { %v112_v17 = vpop.f32.mrb[0].mxu0 }
 0x16a   :  { %v117_v18 = vsel %vm116_vm3, %v112_v17, 0.0  ;;  %v126_v19 = vmul.f32 %v112_v17, %v112_v17  ;;  %v261_v20 = vpop.f32.mrb[1].mxu0 }
 0x16b   :  { %v118_v21 = vrot.slane %v117_v18, 4 }
 0x16c   :  { %v127_v22 = vsel %vm116_vm3, %v126_v19, 0.0 }
 0x16d   :  { %v119_v23 = vadd.f32 %v118_v21, %v117_v18  ;;  %v128_v24 = vrot.slane %v127_v22, 4 }
 0x16f   :  { %v120_v25 = vrot.slane %v119_v23, 2  ;;  %v129_v26 = vadd.f32 %v128_v24, %v127_v22 }
 0x171   :  { %v121_v27 = vadd.f32 %v120_v25, %v119_v23  ;;  %v130_v28 = vrot.slane %v129_v26, 2 }
 0x173   :  { %v122_v29 = vrot.slane %v121_v27, 1  ;;  %v131_v30 = vadd.f32 %v130_v28, %v129_v26 }
 0x175   :  { %v123_v31 = vadd.f32 %v122_v29, %v121_v27  ;;  %v132_v32 = vrot.slane %v131_v30, 1 }
 0x177   :  { %v125_v33 = vmul.f32 0.125, %v123_v31  ;;  %v133_v34 = vadd.f32 %v132_v32, %v131_v30 }
 0x179   :  { %v134_v35 = vmul.f32 0.125, %v133_v34  ;;  %v135_v36 = vmul.f32 %v125_v33, %v125_v33  ;;  %v141_v44 = vsub.f32 %v112_v17, %v125_v33 }
 0x17b   :  { %v136_v37 = vsub.f32 %v134_v35, %v135_v36 }
 0x17d   :  { %v138_v38 = vadd.f32 1e-05, %v136_v37 }
 0x17f   :  { %290 = vrsqrt.f32 %v138_v38 }
 0x189   :  { %v291_v42 = vpop.eup %290 }
 0x18a   :  { %v140_v43 = vmul.f32 %v291_v42, %v137_v40 }
 0x18c   :  { %v145_v45 = vrot.slane %v140_v43, %v144_v41 }
 0x18e   :  { %v146_v47 = vmul.f32 %v145_v45, %v141_v44 }
 0x190   :  { %v152_v48 = vadd.f32 %v244_v46, %v146_v47 }
 0x192   :  { %v153_v49 = vmax.f32 %v152_v48, 0.0 }
 0x194   :  { %271 = vmatmul.mubr.msk.f32.vlgmr.msra.gmra.mrb[0].mxu1 %vm116_vm3, %v153_v49 }
 0x267   :  { %v232_v51 = vpop.f32.mrb[0].mxu1 }
 0x268   :  { %v233_v52 = vadd.f32 %v245_v50, %v232_v51  ;;  %v272_v53 = vpop.f32.mrb[1].mxu1 }
 0x26a   :  { %236 = vst [vmem:[%s388_s4] sm:$0xff] %v233_v52 }
 0x26b   :  { %241 = vsyncpa [#allocation3], 1 }

</bundles_post_ra>
